<compile_context>
chip_gen: v5e
topology: v5e:2x2
jax: 0.10.0
libtpu: 0.0.40
codegen_flags: <defaults>
</compile_context>

<pallas_src>
import jax
import jax.numpy as jnp
from jax.experimental import pallas as pl
from jax.experimental.pallas import tpu as pltpu


def _round_up(n, m):
    return ((n + m - 1) // m) * m


def _pad_feature(n):
    """Pad a hidden feature dim to a 128 multiple; bump to a 256 multiple when
    the 128-rounded value would be an odd multiple of 128 (half-empty MXU pass
    on the 256-wide v6e/v7x MXU)."""
    p = _round_up(n, 128)
    if p > 128 and (p // 128) % 2 == 1:
        p = _round_up(n, 256)
    return p


# ------------------------------- Pallas kernel -------------------------------


def _encoder_kernel(x_ref, w1_ref, b1_ref, w2_ref, b2_ref, w3_ref, b3_ref,
                    wh_ref, bh_ref, out_ref):
    """Fully fused encoder on one batch tile.

    x_ref : (tm, K)      activations, original dtype (cast in-kernel)
    w*_ref: (K*, N*)     weights, padded, compute dtype (f32 or bf16)
    b*_ref: (1, N*)      biases, f32 (f32 bias + ReLU epilogue -> v5e safe)
    wh/bh : merged [mu | log_sigma2] head, each head lane-aligned to 128
    out   : (tm, 2*H128) f32
    """
    cdt = w1_ref.dtype
    e = x_ref[...].astype(cdt)
    for w_ref, b_ref in ((w1_ref, b1_ref), (w2_ref, b2_ref), (w3_ref, b3_ref)):
        acc = jnp.dot(e, w_ref[...], preferred_element_type=jnp.float32)
        e = jnp.maximum(acc + b_ref[...], 0.0).astype(cdt)
    out = jnp.dot(e, wh_ref[...], preferred_element_type=jnp.float32) + bh_ref[...]
    out_ref[...] = out.astype(out_ref.dtype)


# --------------------------- Parameter setup (glue) ---------------------------


def init_linear_params(key, in_c, out_c, dtype=jnp.float32):
    """torch.nn.Linear default init: U(-1/sqrt(fan_in), 1/sqrt(fan_in)).
    Returns torch layout: weight (out, in), bias (out,)."""
    kw, kb = jax.random.split(key)
    bound = 1.0 / jnp.sqrt(jnp.float32(in_c))
    w = jax.random.uniform(kw, (out_c, in_c), dtype, -bound, bound)
    b = jax.random.uniform(kb, (out_c,), dtype, -bound, bound)
    return w, b


def make_encoder_params(key, input_dim, inter_dims, hid_dim):
    dims = [input_dim] + list(inter_dims)
    keys = jax.random.split(key, len(inter_dims) + 2)
    enc = [init_linear_params(keys[i], dims[i], dims[i + 1])
           for i in range(len(inter_dims))]
    mu = init_linear_params(keys[-2], inter_dims[-1], hid_dim)
    ls = init_linear_params(keys[-1], inter_dims[-1], hid_dim)
    return {"encoder": enc, "mu": mu, "log_sigma2": ls}


def pack_encoder_params(params, compute_dtype=jnp.bfloat16):
    """One-time packing for the fused kernel:
      - transpose torch (out,in) weights to (in,out),
      - keep the FIRST layer's K axis at the true input dim (so x needs no
        wrapper-side pad), pad every other feature dim (128/256 multiples),
      - merge mu / log_sigma2 heads, each head lane-aligned to its own 128 slot,
      - pre-cast weights to the compute dtype, keep biases f32 as (1, N)."""
    enc = params["encoder"]
    layers = []
    kp = int(enc[0][0].shape[1])                 # first-layer K: unpadded input dim
    for (w, b) in enc:
        out_c, in_c = w.shape
        np_ = _pad_feature(out_c)
        wt = jnp.zeros((kp, np_), jnp.float32).at[:in_c, :out_c].set(w.T)
        bp = jnp.zeros((1, np_), jnp.float32).at[0, :out_c].set(b)
        layers.append((wt.astype(compute_dtype), bp))
        kp = np_                                 # next layer sees padded width

    wm, bm = params["mu"]
    ws, bs = params["log_sigma2"]
    hid, d = wm.shape
    h1 = _round_up(hid, 128)                     # per-head lane-aligned slot
    wh = (jnp.zeros((kp, 2 * h1), jnp.float32)
          .at[:d, :hid].set(wm.T)
          .at[:d, h1:h1 + hid].set(ws.T))
    bh = (jnp.zeros((1, 2 * h1), jnp.float32)
          .at[0, :hid].set(bm)
          .at[0, h1:h1 + hid].set(bs))

    return {
        "layers": layers,
        "head_w": wh.astype(compute_dtype),
        "head_b": bh,
        "input_dim": int(enc[0][0].shape[1]),
        "hid_dim": int(hid),
        "head_pad": int(h1),
        "compute_dtype": compute_dtype,
    }


# --------------------------------- Wrapper ------------------------------------


def encoder_forward(packed, x):
    """x: (B, input_dim) -> (mu, log_sigma2), each (B, hid_dim) f32."""
    (w1, b1), (w2, b2), (w3, b3) = packed["layers"]
    wh, bh = packed["head_w"], packed["head_b"]
    hid, h1 = packed["hid_dim"], packed["head_pad"]

    batch, k = x.shape
    assert k == packed["input_dim"]
    out_w = wh.shape[1]

    # Batch tiling: one "parallel" grid axis. >= 2 tiles whenever batch > 16 so
    # v7x's two TensorCores both get work; tile capped at 512 rows to keep the
    # VMEM budget safe on v7x (64 MiB physical). Ragged last tile: OOB input
    # rows read garbage that stays row-local, OOB output rows are masked.
    if batch <= 16:
        tm = batch                                   # block == full batch dim
    else:
        tm = min(512, _round_up(pl.cdiv(batch, 2), 16))
    grid = (pl.cdiv(batch, tm),)

    def _wspec(arr):
        # Constant index_map -> DMA'd once, VMEM-resident; single buffer.
        return pl.BlockSpec(arr.shape, lambda i: (0, 0),
                            pipeline_mode=pl.Buffered(1))

    def _nb(a):
        return int(a.size) * a.dtype.itemsize

    weights = (w1, b1, w2, b2, w3, b3, wh, bh)
    w_bytes = sum(_nb(a) for a in weights)           # single-buffered residents
    max_n = max(w1.shape[1], w2.shape[1], w3.shape[1], out_w)
    vmem_est = (w_bytes
                + 2 * tm * k * x.dtype.itemsize      # x tile, double buffered
                + 2 * tm * out_w * 4                 # out tile, double buffered
                + 4 * tm * max_n * 4)                # f32 in-kernel intermediates
    vmem_limit = int(min(max(vmem_est + (2 << 20), 16 << 20), 64 << 20))

    flops = 2 * batch * sum(int(w.shape[0]) * int(w.shape[1])
                            for w in (w1, w2, w3, wh))
    bytes_accessed = w_bytes + _nb(x) + batch * out_w * 4

    out = pl.pallas_call(
        _encoder_kernel,
        out_shape=jax.ShapeDtypeStruct((batch, out_w), jnp.float32),
        grid_spec=pl.GridSpec(
            grid=grid,
            in_specs=[
                pl.BlockSpec((tm, k), lambda i: (i, 0)),
                _wspec(w1), _wspec(b1),
                _wspec(w2), _wspec(b2),
                _wspec(w3), _wspec(b3),
                _wspec(wh), _wspec(bh),
            ],
            out_specs=pl.BlockSpec((tm, out_w), lambda i: (i, 0)),
        ),
        compiler_params=pltpu.CompilerParams(
            dimension_semantics=("parallel",),
            vmem_limit_bytes=vmem_limit),
        cost_estimate=pl.CostEstimate(
            flops=flops, transcendentals=0, bytes_accessed=bytes_accessed),
    )(x, w1, b1, w2, b2, w3, b3, wh, bh)

    mu = out[:, :hid]
    log_sigma2 = out[:, h1:h1 + hid]                 # lane-aligned slice (free)
    return mu, log_sigma2


# ---------------------- Pure-JAX reference (correctness) ----------------------


def encoder_forward_ref(params, x):
    e = x
    for (w, b) in params["encoder"]:
        e = jnp.maximum(e @ w.T + b, 0.0)
    wm, bm = params["mu"]
    ws, bs = params["log_sigma2"]
    return e @ wm.T + bm, e @ ws.T + bs


# ----------------------------------- Main --------------------------------------

if __name__ == "__main__":
    # Small shapes consistent with the module structure
    # (original defaults: input_dim=2000, inter_dims=[200,500,1000], hid_dim=20).
    BATCH = 8
    INPUT_DIM = 256
    INTER_DIMS = [128, 256, 512]
    HID_DIM = 32

    key = jax.random.PRNGKey(0)
    kx, kp, kx2 = jax.random.split(key, 3)
    x = jax.random.normal(kx, (BATCH, INPUT_DIM), jnp.float32)
    params = make_encoder_params(kp, INPUT_DIM, INTER_DIMS, HID_DIM)

    mu_ref, ls_ref = encoder_forward_ref(params, x)

    # f32 compute path (validation / high-accuracy path).
    packed_f32 = pack_encoder_params(params, compute_dtype=jnp.float32)
    mu, log_sigma2 = jax.block_until_ready(encoder_forward(packed_f32, x))
    assert mu.shape == (BATCH, HID_DIM) and log_sigma2.shape == (BATCH, HID_DIM)
    assert jnp.allclose(mu, mu_ref, atol=5e-3, rtol=5e-3)
    assert jnp.allclose(log_sigma2, ls_ref, atol=5e-3, rtol=5e-3)

    # Default bf16 matmul-input path (fast on v5e/v6e/v7x: bf16 MXU inputs,
    # f32 accumulate + f32 bias/ReLU epilogue). Looser tolerance per bf16.
    packed_bf16 = pack_encoder_params(params)
    mu_b, ls_b = jax.block_until_ready(encoder_forward(packed_bf16, x))
    assert jnp.allclose(mu_b, mu_ref, atol=7.5e-2, rtol=7.5e-2)
    assert jnp.allclose(ls_b, ls_ref, atol=7.5e-2, rtol=7.5e-2)

    # Multi-tile path: >= 2 parallel batch tiles with a ragged last tile
    # (exercises the no-wrapper-pad batch handling and OOB write masking).
    B2 = 40
    x2 = jax.random.normal(kx2, (B2, INPUT_DIM), jnp.float32)
    mu2_ref, ls2_ref = encoder_forward_ref(params, x2)
    mu2, ls2 = jax.block_until_ready(encoder_forward(packed_f32, x2))
    assert mu2.shape == (B2, HID_DIM) and ls2.shape == (B2, HID_DIM)
    assert jnp.allclose(mu2, mu2_ref, atol=5e-3, rtol=5e-3)
    assert jnp.allclose(ls2, ls2_ref, atol=5e-3, rtol=5e-3)

    print("KERNEL_OK")
</pallas_src>

<mosaic_0001>
module attributes {stable_mosaic.version = 11 : i64} {
  func.func @_encoder_kernel(%arg0: i32, %arg1: memref<8x256xf32, #tpu.memory_space<vmem>>, %arg2: memref<256x128xf32, #tpu.memory_space<vmem>>, %arg3: memref<1x128xf32, #tpu.memory_space<vmem>>, %arg4: memref<128x256xf32, #tpu.memory_space<vmem>>, %arg5: memref<1x256xf32, #tpu.memory_space<vmem>>, %arg6: memref<256x512xf32, #tpu.memory_space<vmem>>, %arg7: memref<1x512xf32, #tpu.memory_space<vmem>>, %arg8: memref<512x256xf32, #tpu.memory_space<vmem>>, %arg9: memref<1x256xf32, #tpu.memory_space<vmem>>, %arg10: memref<8x256xf32, #tpu.memory_space<vmem>>) attributes {dimension_semantics = [#tpu.dimension_semantics<parallel>], iteration_bounds = array<i64: 1>, scalar_prefetch = 0 : i64, scratch_operands = 0 : i64, tpu.core_type = #tpu.core_type<tc>, window_params = [{transform_indices = @transform_0, window_bounds = array<i64: 8, 256>}, {pipeline_mode = #tpu.pipeline_mode<synchronous>, transform_indices = @transform_1, window_bounds = array<i64: 256, 128>}, {pipeline_mode = #tpu.pipeline_mode<synchronous>, transform_indices = @transform_2, window_bounds = array<i64: 1, 128>}, {pipeline_mode = #tpu.pipeline_mode<synchronous>, transform_indices = @transform_3, window_bounds = array<i64: 128, 256>}, {pipeline_mode = #tpu.pipeline_mode<synchronous>, transform_indices = @transform_4, window_bounds = array<i64: 1, 256>}, {pipeline_mode = #tpu.pipeline_mode<synchronous>, transform_indices = @transform_5, window_bounds = array<i64: 256, 512>}, {pipeline_mode = #tpu.pipeline_mode<synchronous>, transform_indices = @transform_6, window_bounds = array<i64: 1, 512>}, {pipeline_mode = #tpu.pipeline_mode<synchronous>, transform_indices = @transform_7, window_bounds = array<i64: 512, 256>}, {pipeline_mode = #tpu.pipeline_mode<synchronous>, transform_indices = @transform_8, window_bounds = array<i64: 1, 256>}, {transform_indices = @transform_9, window_bounds = array<i64: 8, 256>}]} {
    %c0 = arith.constant 0 : index
    %c0_0 = arith.constant 0 : index
    %0 = vector.load %arg1[%c0, %c0_0] : memref<8x256xf32, #tpu.memory_space<vmem>>, vector<8x256xf32>
    %c0_1 = arith.constant 0 : index
    %c0_2 = arith.constant 0 : index
    %1 = vector.load %arg2[%c0_1, %c0_2] : memref<256x128xf32, #tpu.memory_space<vmem>>, vector<256x128xf32>
    %cst = arith.constant dense<0.000000e+00> : vector<8x128xf32>
    %2 = tpu.matmul %0, %1, %cst {dimension_numbers = #tpu.dot_dimension_numbers<[1], [0], [0], [1], [0, 0, 1, 1], [], []>} : vector<8x256xf32>, vector<256x128xf32>, vector<8x128xf32> -> vector<8x128xf32>
    %c0_3 = arith.constant 0 : index
    %c0_4 = arith.constant 0 : index
    %3 = vector.load %arg3[%c0_3, %c0_4] : memref<1x128xf32, #tpu.memory_space<vmem>>, vector<1x128xf32>
    %4 = vector.broadcast %3 : vector<1x128xf32> to vector<8x128xf32>
    %5 = arith.addf %2, %4 : vector<8x128xf32>
    %cst_5 = arith.constant 0.000000e+00 : f32
    %6 = vector.broadcast %cst_5 : f32 to vector<8x128xf32>
    %7 = arith.maximumf %5, %6 : vector<8x128xf32>
    %c0_6 = arith.constant 0 : index
    %c0_7 = arith.constant 0 : index
    %8 = vector.load %arg4[%c0_6, %c0_7] : memref<128x256xf32, #tpu.memory_space<vmem>>, vector<128x256xf32>
    %cst_8 = arith.constant dense<0.000000e+00> : vector<8x256xf32>
    %9 = tpu.matmul %7, %8, %cst_8 {dimension_numbers = #tpu.dot_dimension_numbers<[1], [0], [0], [1], [0, 0, 1, 1], [], []>} : vector<8x128xf32>, vector<128x256xf32>, vector<8x256xf32> -> vector<8x256xf32>
    %c0_9 = arith.constant 0 : index
    %c0_10 = arith.constant 0 : index
    %10 = vector.load %arg5[%c0_9, %c0_10] : memref<1x256xf32, #tpu.memory_space<vmem>>, vector<1x256xf32>
    %11 = vector.broadcast %10 : vector<1x256xf32> to vector<8x256xf32>
    %12 = arith.addf %9, %11 : vector<8x256xf32>
    %cst_11 = arith.constant 0.000000e+00 : f32
    %13 = vector.broadcast %cst_11 : f32 to vector<8x256xf32>
    %14 = arith.maximumf %12, %13 : vector<8x256xf32>
    %c0_12 = arith.constant 0 : index
    %c0_13 = arith.constant 0 : index
    %15 = vector.load %arg6[%c0_12, %c0_13] : memref<256x512xf32, #tpu.memory_space<vmem>>, vector<256x512xf32>
    %cst_14 = arith.constant dense<0.000000e+00> : vector<8x512xf32>
    %16 = tpu.matmul %14, %15, %cst_14 {dimension_numbers = #tpu.dot_dimension_numbers<[1], [0], [0], [1], [0, 0, 1, 1], [], []>} : vector<8x256xf32>, vector<256x512xf32>, vector<8x512xf32> -> vector<8x512xf32>
    %c0_15 = arith.constant 0 : index
    %c0_16 = arith.constant 0 : index
    %17 = vector.load %arg7[%c0_15, %c0_16] : memref<1x512xf32, #tpu.memory_space<vmem>>, vector<1x512xf32>
    %18 = vector.broadcast %17 : vector<1x512xf32> to vector<8x512xf32>
    %19 = arith.addf %16, %18 : vector<8x512xf32>
    %cst_17 = arith.constant 0.000000e+00 : f32
    %20 = vector.broadcast %cst_17 : f32 to vector<8x512xf32>
    %21 = arith.maximumf %19, %20 : vector<8x512xf32>
    %c0_18 = arith.constant 0 : index
    %c0_19 = arith.constant 0 : index
    %22 = vector.load %arg8[%c0_18, %c0_19] : memref<512x256xf32, #tpu.memory_space<vmem>>, vector<512x256xf32>
    %cst_20 = arith.constant dense<0.000000e+00> : vector<8x256xf32>
    %23 = tpu.matmul %21, %22, %cst_20 {dimension_numbers = #tpu.dot_dimension_numbers<[1], [0], [0], [1], [0, 0, 1, 1], [], []>} : vector<8x512xf32>, vector<512x256xf32>, vector<8x256xf32> -> vector<8x256xf32>
    %c0_21 = arith.constant 0 : index
    %c0_22 = arith.constant 0 : index
    %24 = vector.load %arg9[%c0_21, %c0_22] : memref<1x256xf32, #tpu.memory_space<vmem>>, vector<1x256xf32>
    %25 = vector.broadcast %24 : vector<1x256xf32> to vector<8x256xf32>
    %26 = arith.addf %23, %25 : vector<8x256xf32>
    %c0_23 = arith.constant 0 : index
    %c0_24 = arith.constant 0 : index
    %27 = vector.load %arg10[%c0_23, %c0_24] : memref<8x256xf32, #tpu.memory_space<vmem>>, vector<8x256xf32>
    tpu.vector_store %arg10[%c0_23, %c0_24], %26 {strides = array<i32>} : memref<8x256xf32, #tpu.memory_space<vmem>>, vector<8x256xf32>,
    return
  }
  func.func @transform_0(%arg0: i32) -> (i32, i32) {
    %c0_i32 = arith.constant 0 : i32
    %c0_i32_0 = arith.constant 0 : i32
    return %arg0, %c0_i32 : i32, i32
  }
  func.func @transform_1(%arg0: i32) -> (i32, i32) {
    %c0_i32 = arith.constant 0 : i32
    %c0_i32_0 = arith.constant 0 : i32
    %c0_i32_1 = arith.constant 0 : i32
    return %c0_i32, %c0_i32_0 : i32, i32
  }
  func.func @transform_2(%arg0: i32) -> (i32, i32) {
    %c0_i32 = arith.constant 0 : i32
    %c0_i32_0 = arith.constant 0 : i32
    %c0_i32_1 = arith.constant 0 : i32
    return %c0_i32, %c0_i32_0 : i32, i32
  }
  func.func @transform_3(%arg0: i32) -> (i32, i32) {
    %c0_i32 = arith.constant 0 : i32
    %c0_i32_0 = arith.constant 0 : i32
    %c0_i32_1 = arith.constant 0 : i32
    return %c0_i32, %c0_i32_0 : i32, i32
  }
  func.func @transform_4(%arg0: i32) -> (i32, i32) {
    %c0_i32 = arith.constant 0 : i32
    %c0_i32_0 = arith.constant 0 : i32
    %c0_i32_1 = arith.constant 0 : i32
    return %c0_i32, %c0_i32_0 : i32, i32
  }
  func.func @transform_5(%arg0: i32) -> (i32, i32) {
    %c0_i32 = arith.constant 0 : i32
    %c0_i32_0 = arith.constant 0 : i32
    %c0_i32_1 = arith.constant 0 : i32
    return %c0_i32, %c0_i32_0 : i32, i32
  }
  func.func @transform_6(%arg0: i32) -> (i32, i32) {
    %c0_i32 = arith.constant 0 : i32
    %c0_i32_0 = arith.constant 0 : i32
    %c0_i32_1 = arith.constant 0 : i32
    return %c0_i32, %c0_i32_0 : i32, i32
  }
  func.func @transform_7(%arg0: i32) -> (i32, i32) {
    %c0_i32 = arith.constant 0 : i32
    %c0_i32_0 = arith.constant 0 : i32
    %c0_i32_1 = arith.constant 0 : i32
    return %c0_i32, %c0_i32_0 : i32, i32
  }
  func.func @transform_8(%arg0: i32) -> (i32, i32) {
    %c0_i32 = arith.constant 0 : i32
    %c0_i32_0 = arith.constant 0 : i32
    %c0_i32_1 = arith.constant 0 : i32
    return %c0_i32, %c0_i32_0 : i32, i32
  }
  func.func @transform_9(%arg0: i32) -> (i32, i32) {
    %c0_i32 = arith.constant 0 : i32
    %c0_i32_0 = arith.constant 0 : i32
    return %arg0, %c0_i32 : i32, i32
  }
}

</mosaic_0001>

<bundles_post_ra>
// kernel: tpu_custom_call.1
= control target key start
LH: loop header
LB: loop body
LE: loop exit
PB: predicated region body
PF: predicated region fallthrough
CT: control target
= control target key end

     0   :  { %14 = vsyncpa [#allocation3], 0  ;;  %s1230_s0 = inlined_call_operand.hbm [shape: f32[8,256], index: 0, kind: input, shape index: {}]   ;;  %s1231_s1 = inlined_call_operand.hbm [shape: f32[256,128], index: 1, kind: input, shape index: {}]   ;;  %s1232_s2 = inlined_call_operand.hbm [shape: f32[1,128], index: 2, kind: input, shape index: {}]   ;;  %s1233_s3 = inlined_call_operand.hbm [shape: f32[128,256], index: 3, kind: input, shape index: {}]   ;;  %s1234_s4 = inlined_call_operand.hbm [shape: f32[1,256], index: 4, kind: input, shape index: {}]   ;;  %s1235_s5 = inlined_call_operand.hbm [shape: f32[256,512], index: 5, kind: input, shape index: {}]   ;;  %s1236_s6 = inlined_call_operand.vmem [shape: f32[1,512], index: 6, kind: input, shape index: {}]   ;;  %s1237_s7 = inlined_call_operand.hbm [shape: f32[512,256], index: 7, kind: input, shape index: {}]   ;;  %s1238_s8 = inlined_call_operand.vmem [shape: f32[1,256], index: 8, kind: input, shape index: {}]   ;;  %s1239_s9 = inlined_call_operand.hbm [shape: f32[8,256], index: 9, kind: output, shape index: {}]  }
   0x1   :  { %15 = vsyncpa [#allocation6], 0 }
   0x2   :  { %16 = vsyncpa [#allocation9], 0 }
   0x3   :  { %17 = vsyncpa [#allocation12], 0  ;;  %s34_s11 = sshll.u32 %s1231_s1, 4  ;;  %s35_s11 = int_to_ptr.hbm [resolvable:$true] %s34_s11 }
   0x4   :  { %18 = vsyncpa [#allocation4], 0  ;;  %s1130_s12 = smov [#allocation5]   ;;  %s58_s16 = sshll.u32 %s1233_s3, 4  ;;  %s59_s16 = int_to_ptr.hbm [resolvable:$true] %s58_s16 }
   0x5   :  { %s36_s13 = sshll.u32 %s1130_s12, 4  ;;  %s1131_s17 = smov 128   ;;  %s37_s13 = int_to_ptr.vmem [resolvable:$true] %s36_s13 }
   0x6   :  { %s1132_s18 = smov 8   ;;  %s1133_s19 = smov [#allocation8]  }
   0x7   :  { %42 = dma.hbm_to_vmem [thread:$0]  %s35_s11, 4096, %s37_s13, [#allocation6], %s1131_s17, %s1131_s17, %s1132_s18  }
   0x8   :  { %s60_s20 = sshll.u32 %s1133_s19, 4  ;;  %s1134_s21 = smov 256   ;;  %s61_s20 = int_to_ptr.vmem [resolvable:$true] %s60_s20 }
   0x9   :  { %s1135_s22 = smov 16   ;;  %s82_s24 = sshll.u32 %s1235_s5, 4  ;;  %s83_s24 = int_to_ptr.hbm [resolvable:$true] %s82_s24 }
   0xa   :  { %66 = dma.hbm_to_vmem [thread:$0]  %s59_s16, 4096, %s61_s20, [#allocation9], %s1134_s21, %s1134_s21, %s1135_s22  }
   0xb   :  { %s1136_s25 = smov [#allocation11]   ;;  %s24_s28 = sshll.u32 %s1230_s0, 4  ;;  %s25_s28 = int_to_ptr.hbm [resolvable:$true] %s24_s28 }
   0xc   :  { %s84_s3 = sshll.u32 %s1136_s25, 4  ;;  %s1137_s29 = smov 512   ;;  %s85_s3 = int_to_ptr.vmem [resolvable:$true] %s84_s3 }
   0xd   :  { %s1138_s30 = smov 32   ;;  %s1139_s10 = smov [#allocation2]  }
   0xe   :  { %90 = dma.hbm_to_vmem [thread:$0]  %s83_s24, 16384, %s85_s3, [#allocation12], %s1137_s29, %s1137_s29, %s1138_s30  }
   0xf   :  { %s26_s11 = sshll.u32 %s1139_s10, 4  ;;  %s48_s14 = sshll.u32 %s1232_s2, 4  ;;  %s27_s11 = int_to_ptr.vmem [resolvable:$true] %s26_s11  ;;  %s49_s14 = int_to_ptr.hbm [resolvable:$true] %s48_s14 }
  0x10   :  { %29 = dma.hbm_to_vmem [thread:$0]  %s25_s28, 256, %s27_s11, [#allocation3]  }
  0x11   :  { %s72_s16 = sshll.u32 %s1234_s4, 4  ;;  %s1140_s17 = smov [#allocation7]   ;;  %s73_s16 = int_to_ptr.hbm [resolvable:$true] %s72_s16 }
  0x12   :  { %s50_s18 = sshll.u32 %s1140_s17, 4  ;;  %s1141_s0 = smov [#allocation10]   ;;  %s51_s18 = int_to_ptr.vmem [resolvable:$true] %s50_s18 }
  0x13   :  { %53 = dma.hbm_to_vmem [thread:$0]  %s49_s14, 16, %s51_s18, [#allocation6]  }
  0x14   :  { %s74_s19 = sshll.u32 %s1141_s0, 4  ;;  %s97_s23 = sshll.u32 %s1237_s7, 4  ;;  %s75_s19 = int_to_ptr.vmem [resolvable:$true] %s74_s19  ;;  %s98_s23 = int_to_ptr.hbm [resolvable:$true] %s97_s23 }
  0x15   :  { %77 = dma.hbm_to_vmem [thread:$0]  %s73_s16, 32, %s75_s19, [#allocation9]  }
  0x16   :  { %s1142_s2 = smov [#allocation13]  }
  0x17   :  { %s99_s24 = sshll.u32 %s1142_s2, 4  ;;  %s100_s24 = int_to_ptr.vmem [resolvable:$true] %s99_s24 }
  0x18   :  { %105 = dma.hbm_to_vmem [thread:$0]  %s98_s23, 16384, %s100_s24, [#allocation12], %s1134_s21, %s1134_s21, %s1135_s22  }
  0x19   :  { %1120 = dma.done.wait [#allocation3], 256  }
  0x1a   :  { %1121 = vsyncadd [#allocation3], 4294967040 }
  0x1b   :  { %1122 = dma.done.wait [#allocation6], 4112  }
  0x1c   :  { %1123 = vsyncadd [#allocation6], 4294963184 }
  0x1d   :  { %1124 = dma.done.wait [#allocation9], 4128  }
  0x1e   :  { %1125 = vsyncadd [#allocation9], 4294963168 }
  0x1f   :  { %1126 = dma.done.wait [#allocation12], 32768  }
  0x20   :  { %1127 = vsyncadd [#allocation12], 4294934528  ;;  %v153_v0 = vld [vmem:[#allocation5 + $0x78] sm:$0xff]  ;;  %v152_v1 = vld [vmem:[#allocation5 + $0x70] sm:$0xff]  ;;  %s1143_s22 = smov [#allocation14]   ;;  %s900_s26 = sshll.u32 %s1239_s9, 4  ;;  %s901_s26 = int_to_ptr.hbm [resolvable:$true] %s900_s26 }
  0x21   :  { %v169_v2 = vld [vmem:[#allocation5 + $0xf8] sm:$0xff]  ;;  %174 = vmatpush.msra.mxu0 %v153_v0  ;;  %v168_v3 = vld [vmem:[#allocation5 + $0xf0] sm:$0xff]  ;;  %v151_v4 = vld [vmem:[#allocation5 + $0x68] sm:$0xff]  ;;  %s898_s25 = sshll.u32 %s1143_s22, 4  ;;  %s899_s25 = int_to_ptr.vmem [resolvable:$true] %s898_s25 }
  0x22   :  { %194 = vmatpush.msra.mxu1 %v169_v2  ;;  %v167_v5 = vld [vmem:[#allocation5 + $0xe8] sm:$0xff]  ;;  %v150_v6 = vld [vmem:[#allocation5 + $0x60] sm:$0xff]  ;;  %v149_v8 = vld [vmem:[#allocation5 + $0x58] sm:$0xff] }
  0x23   :  { %175 = vmatpush.msra.mxu0 %v152_v1  ;;  %v166_v7 = vld [vmem:[#allocation5 + $0xe0] sm:$0xff]  ;;  %v165_v9 = vld [vmem:[#allocation5 + $0xd8] sm:$0xff]  ;;  %v148_v10 = vld [vmem:[#allocation5 + $0x50] sm:$0xff] }
  0x24   :  { %195 = vmatpush.msra.mxu1 %v168_v3  ;;  %v164_v11 = vld [vmem:[#allocation5 + $0xd0] sm:$0xff]  ;;  %v147_v12 = vld [vmem:[#allocation5 + $0x48] sm:$0xff]  ;;  %v146_v14 = vld [vmem:[#allocation5 + $0x40] sm:$0xff] }
  0x25   :  { %176 = vmatpush.msra.mxu0 %v151_v4  ;;  %v163_v13 = vld [vmem:[#allocation5 + $0xc8] sm:$0xff]  ;;  %v245_v15 = vld [vmem:[#allocation8 + $0xf0] sm:$0xff]  ;;  %v246_v16 = vld [vmem:[#allocation8 + $0xf8] sm:$0xff] }
  0x26   :  { %196 = vmatpush.msra.mxu1 %v167_v5  ;;  %v162_v17 = vld [vmem:[#allocation5 + $0xc0] sm:$0xff]  ;;  %253 = vmatpush.msra.mxu2 %v245_v15  ;;  %v244_v19 = vld [vmem:[#allocation8 + $0xe8] sm:$0xff]  ;;  %v241_v20 = vld [vmem:[#allocation8 + $0xd0] sm:$0xff] }
  0x27   :  { %177 = vmatpush.msra.mxu0 %v150_v6  ;;  %273 = vmatpush.msra.mxu3 %v246_v16  ;;  %v243_v18 = vld [vmem:[#allocation8 + $0xe0] sm:$0xff]  ;;  %v242_v21 = vld [vmem:[#allocation8 + $0xd8] sm:$0xff]  ;;  %v240_v25 = vld [vmem:[#allocation8 + $0xc8] sm:$0xff] }
  0x28   :  { %197 = vmatpush.msra.mxu1 %v166_v7  ;;  %v145_v22 = vld [vmem:[#allocation5 + $0x38] sm:$0xff]  ;;  %254 = vmatpush.msra.mxu2 %v243_v18  ;;  %v239_v24 = vld [vmem:[#allocation8 + $0xc0] sm:$0xff]  ;;  %v144_v26 = vld [vmem:[#allocation5 + $0x30] sm:$0xff] }
  0x29   :  { %178 = vmatpush.msra.mxu0 %v149_v8  ;;  %v161_v23 = vld [vmem:[#allocation5 + $0xb8] sm:$0xff]  ;;  %274 = vmatpush.msra.mxu3 %v244_v19  ;;  %v160_v27 = vld [vmem:[#allocation5 + $0xb0] sm:$0xff]  ;;  %v143_v30 = vld [vmem:[#allocation5 + $0x28] sm:$0xff] }
  0x2a   :  { %198 = vmatpush.msra.mxu1 %v165_v9  ;;  %255 = vmatpush.msra.mxu2 %v241_v20  ;;  %v237_v28 = vld [vmem:[#allocation8 + $0xb0] sm:$0xff]  ;;  %v238_v29 = vld [vmem:[#allocation8 + $0xb8] sm:$0xff]  ;;  %v159_v31 = vld [vmem:[#allocation5 + $0xa8] sm:$0xff] }
  0x2b   :  { %179 = vmatpush.msra.mxu0 %v148_v10  ;;  %275 = vmatpush.msra.mxu3 %v242_v21  ;;  %v235_v32 = vld [vmem:[#allocation8 + $0xa0] sm:$0xff]  ;;  %v236_v33 = vld [vmem:[#allocation8 + $0xa8] sm:$0xff]  ;;  %v233_v36 = vld [vmem:[#allocation8 + $0x90] sm:$0xff] }
  0x2c   :  { %199 = vmatpush.msra.mxu1 %v164_v11  ;;  %256 = vmatpush.msra.mxu2 %v239_v24  ;;  %v142_v34 = vld [vmem:[#allocation5 + $0x20] sm:$0xff]  ;;  %v141_v38 = vld [vmem:[#allocation5 + $0x18] sm:$0xff]  ;;  %v232_v41 = vld [vmem:[#allocation8 + $0x88] sm:$0xff] }
  0x2d   :  { %180 = vmatpush.msra.mxu0 %v147_v12  ;;  %276 = vmatpush.msra.mxu3 %v240_v25  ;;  %v158_v35 = vld [vmem:[#allocation5 + $0xa0] sm:$0xff]  ;;  %v157_v39 = vld [vmem:[#allocation5 + $0x98] sm:$0xff]  ;;  %v140_v42 = vld [vmem:[#allocation5 + $0x10] sm:$0xff] }
  0x2e   :  { %200 = vmatpush.msra.mxu1 %v163_v13  ;;  %257 = vmatpush.msra.mxu2 %v237_v28  ;;  %v234_v37 = vld [vmem:[#allocation8 + $0x98] sm:$0xff]  ;;  %v231_v40 = vld [vmem:[#allocation8 + $0x80] sm:$0xff]  ;;  %v156_v43 = vld [vmem:[#allocation5 + $0x90] sm:$0xff] }
  0x2f   :  { %181 = vmatpush.msra.mxu0 %v146_v14  ;;  %277 = vmatpush.msra.mxu3 %v238_v29  ;;  %v229_v44 = vld [vmem:[#allocation8 + $0x70] sm:$0xff]  ;;  %v230_v45 = vld [vmem:[#allocation8 + $0x78] sm:$0xff]  ;;  %v139_v46 = vld [vmem:[#allocation5 + $0x8] sm:$0xff] }
  0x30   :  { %201 = vmatpush.msra.mxu1 %v162_v17  ;;  %258 = vmatpush.msra.mxu2 %v235_v32  ;;  %v155_v47 = vld [vmem:[#allocation5 + $0x88] sm:$0xff]  ;;  %v138_v50 = vld [vmem:[#allocation5] sm:$0xff]  ;;  %v136_v52 = vld [vmem:[#allocation2] sm:$0xff] }
  0x31   :  { %182 = vmatpush.msra.mxu0 %v145_v22  ;;  %278 = vmatpush.msra.mxu3 %v236_v33  ;;  %v227_v48 = vld [vmem:[#allocation8 + $0x60] sm:$0xff]  ;;  %v228_v49 = vld [vmem:[#allocation8 + $0x68] sm:$0xff]  ;;  %v137_v53 = vld [vmem:[#allocation2 + $0x8] sm:$0xff] }
  0x32   :  { %202 = vmatpush.msra.mxu1 %v161_v23  ;;  %259 = vmatpush.msra.mxu2 %v233_v36  ;;  %v154_v51 = vld [vmem:[#allocation5 + $0x80] sm:$0xff]  ;;  %v225_v54 = vld [vmem:[#allocation8 + $0x50] sm:$0xff]  ;;  %v224_v57 = vld [vmem:[#allocation8 + $0x48] sm:$0xff] }
  0x33   :  { %183 = vmatpush.msra.mxu0 %v144_v26  ;;  %279 = vmatpush.msra.mxu3 %v234_v37  ;;  %v226_v55 = vld [vmem:[#allocation8 + $0x58] sm:$0xff]  ;;  %v223_v56 = vld [vmem:[#allocation8 + $0x40] sm:$0xff]  ;;  %v221_v58 = vld [vmem:[#allocation8 + $0x30] sm:$0xff] }
  0x34   :  { %203 = vmatpush.msra.mxu1 %v160_v27  ;;  %260 = vmatpush.msra.mxu2 %v231_v40  ;;  %v222_v59 = vld [vmem:[#allocation8 + $0x38] sm:$0xff]  ;;  %v219_v60 = vld [vmem:[#allocation8 + $0x20] sm:$0xff]  ;;  %v220_v61 = vld [vmem:[#allocation8 + $0x28] sm:$0xff] }
  0x35   :  { %184 = vmatpush.msra.mxu0 %v143_v30  ;;  %280 = vmatpush.msra.mxu3 %v232_v41  ;;  %v217_v62 = vld [vmem:[#allocation8 + $0x10] sm:$0xff]  ;;  %v218_v63 = vld [vmem:[#allocation8 + $0x18] sm:$0xff]  ;;  %v215_v0 = vld [vmem:[#allocation8] sm:$0xff] }
  0x36   :  { %204 = vmatpush.msra.mxu1 %v159_v31  ;;  %261 = vmatpush.msra.mxu2 %v229_v44  ;;  %v216_v1 = vld [vmem:[#allocation8 + $0x8] sm:$0xff] }
  0x37   :  { %185 = vmatpush.msra.mxu0 %v142_v34  ;;  %281 = vmatpush.msra.mxu3 %v230_v45  ;;  %v355_v2 = vld [vmem:[#allocation11 + $0x1e0] sm:$0xff]  ;;  %v356_v4 = vld [vmem:[#allocation11 + $0x1e8] sm:$0xff] }
  0x38   :  { %205 = vmatpush.msra.mxu1 %v158_v35  ;;  %262 = vmatpush.msra.mxu2 %v227_v48  ;;  %v419_v3 = vld [vmem:[#allocation11 + $0x3e0] sm:$0xff]  ;;  %v420_v5 = vld [vmem:[#allocation11 + $0x3e8] sm:$0xff] }
  0x39   :  { %186 = vmatpush.msra.mxu0 %v141_v38  ;;  %282 = vmatpush.msra.mxu3 %v228_v49  ;;  %v351_v6 = vld [vmem:[#allocation11 + $0x1c0] sm:$0xff]  ;;  %v352_v8 = vld [vmem:[#allocation11 + $0x1c8] sm:$0xff] }
  0x3a   :  { %206 = vmatpush.msra.mxu1 %v157_v39  ;;  %263 = vmatpush.msra.mxu2 %v225_v54  ;;  %v415_v7 = vld [vmem:[#allocation11 + $0x3c0] sm:$0xff]  ;;  %v416_v9 = vld [vmem:[#allocation11 + $0x3c8] sm:$0xff] }
  0x3b   :  { %187 = vmatpush.msra.mxu0 %v140_v42  ;;  %283 = vmatpush.msra.mxu3 %v226_v55  ;;  %v347_v10 = vld [vmem:[#allocation11 + $0x1a0] sm:$0xff]  ;;  %v348_v12 = vld [vmem:[#allocation11 + $0x1a8] sm:$0xff] }
  0x3c   :  { %207 = vmatpush.msra.mxu1 %v156_v43  ;;  %264 = vmatpush.msra.mxu2 %v223_v56  ;;  %v411_v11 = vld [vmem:[#allocation11 + $0x3a0] sm:$0xff]  ;;  %v412_v13 = vld [vmem:[#allocation11 + $0x3a8] sm:$0xff] }
  0x3d   :  { %188 = vmatpush.msra.mxu0 %v139_v46  ;;  %284 = vmatpush.msra.mxu3 %v224_v57  ;;  %v343_v14 = vld [vmem:[#allocation11 + $0x180] sm:$0xff]  ;;  %v344_v16 = vld [vmem:[#allocation11 + $0x188] sm:$0xff] }
  0x3e   :  { %208 = vmatpush.msra.mxu1 %v155_v47  ;;  %265 = vmatpush.msra.mxu2 %v221_v58  ;;  %v407_v15 = vld [vmem:[#allocation11 + $0x380] sm:$0xff]  ;;  %v408_v17 = vld [vmem:[#allocation11 + $0x388] sm:$0xff] }
  0x3f   :  { %189 = vmatpush.msra.mxu0 %v138_v50  ;;  %285 = vmatpush.msra.mxu3 %v222_v59  ;;  %v339_v18 = vld [vmem:[#allocation11 + $0x160] sm:$0xff]  ;;  %v340_v20 = vld [vmem:[#allocation11 + $0x168] sm:$0xff]  ;;  %v927_v50 = vld [vmem:[#allocation7] ss:$0 sm:$0xff] }
  0x40   :  { %209 = vmatpush.msra.mxu1 %v154_v51  ;;  %190 = vmatmul.f32.vlgmr.msra.gmra.mxu0 %v136_v52  ;;  %v403_v19 = vld [vmem:[#allocation11 + $0x360] sm:$0xff]  ;;  %v404_v21 = vld [vmem:[#allocation11 + $0x368] sm:$0xff] }
  0x41   :  { %210 = vmatmul.f32.vlgmr.msra.gmra.mxu1 %v137_v53  ;;  %266 = vmatpush.msra.mxu2 %v219_v60  ;;  %v335_v22 = vld [vmem:[#allocation11 + $0x140] sm:$0xff]  ;;  %v336_v24 = vld [vmem:[#allocation11 + $0x148] sm:$0xff] }
  0x42   :  { %286 = vmatpush.msra.mxu3 %v220_v61  ;;  %433 = vmatpush.msrb.mxu0 %v355_v2  ;;  %v399_v23 = vld [vmem:[#allocation11 + $0x340] sm:$0xff]  ;;  %v400_v25 = vld [vmem:[#allocation11 + $0x348] sm:$0xff] }
  0x43   :  { %267 = vmatpush.msra.mxu2 %v217_v62  ;;  %453 = vmatpush.msrb.mxu1 %v419_v3  ;;  %v331_v26 = vld [vmem:[#allocation11 + $0x120] sm:$0xff]  ;;  %v332_v28 = vld [vmem:[#allocation11 + $0x128] sm:$0xff] }
  0x44   :  { %287 = vmatpush.msra.mxu3 %v218_v63  ;;  %434 = vmatpush.msrb.mxu0 %v351_v6  ;;  %v395_v27 = vld [vmem:[#allocation11 + $0x320] sm:$0xff]  ;;  %v396_v29 = vld [vmem:[#allocation11 + $0x328] sm:$0xff] }
  0x45   :  { %268 = vmatpush.msra.mxu2 %v215_v0  ;;  %454 = vmatpush.msrb.mxu1 %v415_v7  ;;  %v327_v30 = vld [vmem:[#allocation11 + $0x100] sm:$0xff]  ;;  %v328_v32 = vld [vmem:[#allocation11 + $0x108] sm:$0xff] }
  0x46   :  { %288 = vmatpush.msra.mxu3 %v216_v1  ;;  %435 = vmatpush.msrb.mxu0 %v347_v10  ;;  %v391_v31 = vld [vmem:[#allocation11 + $0x300] sm:$0xff]  ;;  %v392_v33 = vld [vmem:[#allocation11 + $0x308] sm:$0xff]  ;;  %v358_v10 = vld [vmem:[#allocation11 + $0x1f8] sm:$0xff] }
  0x47   :  { %473 = vmatpush.msrb.mxu2 %v356_v4  ;;  %455 = vmatpush.msrb.mxu1 %v411_v11  ;;  %v323_v34 = vld [vmem:[#allocation11 + $0xe0] sm:$0xff]  ;;  %v324_v36 = vld [vmem:[#allocation11 + $0xe8] sm:$0xff]  ;;  %v422_v11 = vld [vmem:[#allocation11 + $0x3f8] sm:$0xff] }
  0x48   :  { %493 = vmatpush.msrb.mxu3 %v420_v5  ;;  %436 = vmatpush.msrb.mxu0 %v343_v14  ;;  %v387_v35 = vld [vmem:[#allocation11 + $0x2e0] sm:$0xff]  ;;  %v388_v37 = vld [vmem:[#allocation11 + $0x2e8] sm:$0xff]  ;;  %v354_v14 = vld [vmem:[#allocation11 + $0x1d8] sm:$0xff] }
  0x49   :  { %474 = vmatpush.msrb.mxu2 %v352_v8  ;;  %456 = vmatpush.msrb.mxu1 %v407_v15  ;;  %v319_v38 = vld [vmem:[#allocation11 + $0xc0] sm:$0xff]  ;;  %v320_v40 = vld [vmem:[#allocation11 + $0xc8] sm:$0xff]  ;;  %v357_v8 = vld [vmem:[#allocation11 + $0x1f0] sm:$0xff] }
  0x4a   :  { %494 = vmatpush.msrb.mxu3 %v416_v9  ;;  %437 = vmatpush.msrb.mxu0 %v339_v18  ;;  %v383_v39 = vld [vmem:[#allocation11 + $0x2c0] sm:$0xff]  ;;  %v384_v41 = vld [vmem:[#allocation11 + $0x2c8] sm:$0xff]  ;;  %v421_v9 = vld [vmem:[#allocation11 + $0x3f0] sm:$0xff] }
  0x4b   :  { %475 = vmatpush.msrb.mxu2 %v348_v12  ;;  %457 = vmatpush.msrb.mxu1 %v403_v19  ;;  %v315_v42 = vld [vmem:[#allocation11 + $0xa0] sm:$0xff]  ;;  %v316_v44 = vld [vmem:[#allocation11 + $0xa8] sm:$0xff]  ;;  %v353_v12 = vld [vmem:[#allocation11 + $0x1d0] sm:$0xff] }
  0x4c   :  { %495 = vmatpush.msrb.mxu3 %v412_v13  ;;  %438 = vmatpush.msrb.mxu0 %v335_v22  ;;  %v379_v43 = vld [vmem:[#allocation11 + $0x2a0] sm:$0xff]  ;;  %v380_v45 = vld [vmem:[#allocation11 + $0x2a8] sm:$0xff]  ;;  %v417_v13 = vld [vmem:[#allocation11 + $0x3d0] sm:$0xff] }
  0x4d   :  { %476 = vmatpush.msrb.mxu2 %v344_v16  ;;  %458 = vmatpush.msrb.mxu1 %v399_v23  ;;  %v311_v46 = vld [vmem:[#allocation11 + $0x80] sm:$0xff]  ;;  %v312_v48 = vld [vmem:[#allocation11 + $0x88] sm:$0xff]  ;;  %v418_v15 = vld [vmem:[#allocation11 + $0x3d8] sm:$0xff] }
  0x4e   :  { %496 = vmatpush.msrb.mxu3 %v408_v17  ;;  %439 = vmatpush.msrb.mxu0 %v331_v26  ;;  %v375_v47 = vld [vmem:[#allocation11 + $0x280] sm:$0xff]  ;;  %v376_v49 = vld [vmem:[#allocation11 + $0x288] sm:$0xff]  ;;  %v349_v16 = vld [vmem:[#allocation11 + $0x1b0] sm:$0xff] }
  0x4f   :  { %477 = vmatpush.msrb.mxu2 %v340_v20  ;;  %459 = vmatpush.msrb.mxu1 %v395_v27  ;;  %v307_v51 = vld [vmem:[#allocation11 + $0x60] sm:$0xff]  ;;  %v308_v53 = vld [vmem:[#allocation11 + $0x68] sm:$0xff]  ;;  %v413_v17 = vld [vmem:[#allocation11 + $0x3b0] sm:$0xff] }
  0x50   :  { %497 = vmatpush.msrb.mxu3 %v404_v21  ;;  %440 = vmatpush.msrb.mxu0 %v327_v30  ;;  %v371_v52 = vld [vmem:[#allocation11 + $0x260] sm:$0xff]  ;;  %v372_v54 = vld [vmem:[#allocation11 + $0x268] sm:$0xff]  ;;  %v350_v18 = vld [vmem:[#allocation11 + $0x1b8] sm:$0xff] }
  0x51   :  { %478 = vmatpush.msrb.mxu2 %v336_v24  ;;  %460 = vmatpush.msrb.mxu1 %v391_v31  ;;  %v303_v55 = vld [vmem:[#allocation11 + $0x40] sm:$0xff]  ;;  %v304_v59 = vld [vmem:[#allocation11 + $0x48] sm:$0xff]  ;;  %v414_v19 = vld [vmem:[#allocation11 + $0x3b8] sm:$0xff] }
  0x52   :  { %498 = vmatpush.msrb.mxu3 %v400_v25  ;;  %441 = vmatpush.msrb.mxu0 %v323_v34  ;;  %v367_v56 = vld [vmem:[#allocation11 + $0x240] sm:$0xff]  ;;  %v368_v60 = vld [vmem:[#allocation11 + $0x248] sm:$0xff]  ;;  %v345_v20 = vld [vmem:[#allocation11 + $0x190] sm:$0xff] }
  0x53   :  { %479 = vmatpush.msrb.mxu2 %v332_v28  ;;  %461 = vmatpush.msrb.mxu1 %v387_v35  ;;  %v299_v62 = vld [vmem:[#allocation11 + $0x20] sm:$0xff]  ;;  %v300_v0 = vld [vmem:[#allocation11 + $0x28] sm:$0xff]  ;;  %v409_v21 = vld [vmem:[#allocation11 + $0x390] sm:$0xff] }
  0x54   :  { %499 = vmatpush.msrb.mxu3 %v396_v29  ;;  %442 = vmatpush.msrb.mxu0 %v319_v38  ;;  %v363_v63 = vld [vmem:[#allocation11 + $0x220] sm:$0xff]  ;;  %v364_v1 = vld [vmem:[#allocation11 + $0x228] sm:$0xff]  ;;  %v346_v22 = vld [vmem:[#allocation11 + $0x198] sm:$0xff] }
  0x55   :  { %480 = vmatpush.msrb.mxu2 %v328_v32  ;;  %462 = vmatpush.msrb.mxu1 %v383_v39  ;;  %v295_v3 = vld [vmem:[#allocation11] sm:$0xff]  ;;  %v296_v6 = vld [vmem:[#allocation11 + $0x8] sm:$0xff]  ;;  %v410_v23 = vld [vmem:[#allocation11 + $0x398] sm:$0xff] }
  0x56   :  { %500 = vmatpush.msrb.mxu3 %v392_v33  ;;  %443 = vmatpush.msrb.mxu0 %v315_v42  ;;  %v359_v4 = vld [vmem:[#allocation11 + $0x200] sm:$0xff]  ;;  %v360_v7 = vld [vmem:[#allocation11 + $0x208] sm:$0xff]  ;;  %v341_v24 = vld [vmem:[#allocation11 + $0x170] sm:$0xff] }
  0x57   :  { %481 = vmatpush.msrb.mxu2 %v324_v36  ;;  %463 = vmatpush.msrb.mxu1 %v379_v43  ;;  %v405_v25 = vld [vmem:[#allocation11 + $0x370] sm:$0xff]  ;;  %v342_v26 = vld [vmem:[#allocation11 + $0x178] sm:$0xff] }
  0x58   :  { %501 = vmatpush.msrb.mxu3 %v388_v37  ;;  %444 = vmatpush.msrb.mxu0 %v311_v46  ;;  %v406_v27 = vld [vmem:[#allocation11 + $0x378] sm:$0xff]  ;;  %v337_v28 = vld [vmem:[#allocation11 + $0x150] sm:$0xff] }
  0x59   :  { %482 = vmatpush.msrb.mxu2 %v320_v40  ;;  %464 = vmatpush.msrb.mxu1 %v375_v47  ;;  %v401_v29 = vld [vmem:[#allocation11 + $0x350] sm:$0xff]  ;;  %v338_v30 = vld [vmem:[#allocation11 + $0x158] sm:$0xff] }
  0x5a   :  { %502 = vmatpush.msrb.mxu3 %v384_v41  ;;  %445 = vmatpush.msrb.mxu0 %v307_v51  ;;  %v402_v31 = vld [vmem:[#allocation11 + $0x358] sm:$0xff]  ;;  %v333_v32 = vld [vmem:[#allocation11 + $0x130] sm:$0xff] }
  0x5b   :  { %483 = vmatpush.msrb.mxu2 %v316_v44  ;;  %465 = vmatpush.msrb.mxu1 %v371_v52  ;;  %v397_v33 = vld [vmem:[#allocation11 + $0x330] sm:$0xff]  ;;  %v334_v34 = vld [vmem:[#allocation11 + $0x138] sm:$0xff] }
  0x5c   :  { %503 = vmatpush.msrb.mxu3 %v380_v45  ;;  %446 = vmatpush.msrb.mxu0 %v303_v55  ;;  %v398_v35 = vld [vmem:[#allocation11 + $0x338] sm:$0xff]  ;;  %v329_v36 = vld [vmem:[#allocation11 + $0x110] sm:$0xff] }
  0x5d   :  { %484 = vmatpush.msrb.mxu2 %v312_v48  ;;  %466 = vmatpush.msrb.mxu1 %v367_v56  ;;  %v393_v37 = vld [vmem:[#allocation11 + $0x310] sm:$0xff]  ;;  %v330_v38 = vld [vmem:[#allocation11 + $0x118] sm:$0xff] }
  0x5e   :  { %504 = vmatpush.msrb.mxu3 %v376_v49  ;;  %447 = vmatpush.msrb.mxu0 %v299_v62  ;;  %v394_v39 = vld [vmem:[#allocation11 + $0x318] sm:$0xff]  ;;  %v325_v40 = vld [vmem:[#allocation11 + $0xf0] sm:$0xff] }
  0x5f   :  { %485 = vmatpush.msrb.mxu2 %v308_v53  ;;  %467 = vmatpush.msrb.mxu1 %v363_v63  ;;  %v389_v41 = vld [vmem:[#allocation11 + $0x2f0] sm:$0xff]  ;;  %v326_v42 = vld [vmem:[#allocation11 + $0xf8] sm:$0xff] }
  0x60   :  { %505 = vmatpush.msrb.mxu3 %v372_v54  ;;  %448 = vmatpush.msrb.mxu0 %v295_v3  ;;  %v390_v43 = vld [vmem:[#allocation11 + $0x2f8] sm:$0xff]  ;;  %v321_v44 = vld [vmem:[#allocation11 + $0xd0] sm:$0xff] }
  0x61   :  { %486 = vmatpush.msrb.mxu2 %v304_v59  ;;  %468 = vmatpush.msrb.mxu1 %v359_v4  ;;  %v385_v45 = vld [vmem:[#allocation11 + $0x2d0] sm:$0xff]  ;;  %v322_v46 = vld [vmem:[#allocation11 + $0xd8] sm:$0xff] }
  0x62   :  { %506 = vmatpush.msrb.mxu3 %v368_v60  ;;  %513 = vmatpush.msra.mxu0 %v357_v8  ;;  %v386_v47 = vld [vmem:[#allocation11 + $0x2d8] sm:$0xff]  ;;  %v317_v48 = vld [vmem:[#allocation11 + $0xb0] sm:$0xff] }
  0x63   :  { %487 = vmatpush.msrb.mxu2 %v300_v0  ;;  %533 = vmatpush.msra.mxu1 %v421_v9  ;;  %v381_v49 = vld [vmem:[#allocation11 + $0x2b0] sm:$0xff]  ;;  %v382_v51 = vld [vmem:[#allocation11 + $0x2b8] sm:$0xff] }
  0x64   :  { %507 = vmatpush.msrb.mxu3 %v364_v1  ;;  %514 = vmatpush.msra.mxu0 %v353_v12  ;;  %v313_v52 = vld [vmem:[#allocation11 + $0x90] sm:$0xff]  ;;  %v314_v54 = vld [vmem:[#allocation11 + $0x98] sm:$0xff] }
  0x65   :  { %488 = vmatpush.msrb.mxu2 %v296_v6  ;;  %534 = vmatpush.msra.mxu1 %v417_v13  ;;  %v377_v53 = vld [vmem:[#allocation11 + $0x290] sm:$0xff]  ;;  %v378_v55 = vld [vmem:[#allocation11 + $0x298] sm:$0xff] }
  0x66   :  { %508 = vmatpush.msrb.mxu3 %v360_v7  ;;  %515 = vmatpush.msra.mxu0 %v349_v16  ;;  %v309_v56 = vld [vmem:[#allocation11 + $0x70] sm:$0xff]  ;;  %v374_v59 = vld [vmem:[#allocation11 + $0x278] sm:$0xff] }
  0x67   :  { %535 = vmatpush.msra.mxu1 %v413_v17  ;;  %v305_v60 = vld [vmem:[#allocation11 + $0x50] sm:$0xff]  ;;  %v306_v62 = vld [vmem:[#allocation11 + $0x58] sm:$0xff] }
  0x68   :  { %516 = vmatpush.msra.mxu0 %v345_v20  ;;  %v370_v63 = vld [vmem:[#allocation11 + $0x258] sm:$0xff]  ;;  %v301_v0 = vld [vmem:[#allocation11 + $0x30] sm:$0xff] }
  0x69   :  { %536 = vmatpush.msra.mxu1 %v409_v21  ;;  %v365_v1 = vld [vmem:[#allocation11 + $0x230] sm:$0xff]  ;;  %v366_v3 = vld [vmem:[#allocation11 + $0x238] sm:$0xff]  ;;  %v625_v21 = vld [vmem:[#allocation13 + $0xe0] sm:$0xff] }
  0x6a   :  { %517 = vmatpush.msra.mxu0 %v341_v24  ;;  %v297_v4 = vld [vmem:[#allocation11 + $0x10] sm:$0xff]  ;;  %v298_v6 = vld [vmem:[#allocation11 + $0x18] sm:$0xff]  ;;  %v721_v24 = vld [vmem:[#allocation13 + $0x3e0] sm:$0xff] }
  0x6b   :  { %537 = vmatpush.msra.mxu1 %v405_v25  ;;  %v362_v7 = vld [vmem:[#allocation11 + $0x218] sm:$0xff]  ;;  %v627_v17 = vld [vmem:[#allocation13 + $0xf0] sm:$0xff] }
  0x6c   :  { %518 = vmatpush.msra.mxu0 %v337_v28  ;;  %v247_v8 = vld [vmem:[#allocation10] sm:$0x3]  ;;  %v723_v20 = vld [vmem:[#allocation13 + $0x3f0] sm:$0xff] }
  0x6d   :  { %538 = vmatpush.msra.mxu1 %v401_v29  ;;  %v249_v9 = vperm.slane %v247_v8, 0  ;;  %v623_v25 = vld [vmem:[#allocation13 + $0xd0] sm:$0xff]  ;;  %v621_v29 = vld [vmem:[#allocation13 + $0xc0] sm:$0xff] }
  0x6e   :  { %519 = vmatpush.msra.mxu0 %v333_v32  ;;  %v719_v28 = vld [vmem:[#allocation13 + $0x3d0] sm:$0xff]  ;;  %v717_v32 = vld [vmem:[#allocation13 + $0x3c0] sm:$0xff] }
  0x6f   :  { %539 = vmatpush.msra.mxu1 %v397_v33  ;;  %v619_v33 = vld [vmem:[#allocation13 + $0xb0] sm:$0xff] }
  0x70   :  { %520 = vmatpush.msra.mxu0 %v329_v36  ;;  %v715_v36 = vld [vmem:[#allocation13 + $0x3b0] sm:$0xff] }
  0x71   :  { %540 = vmatpush.msra.mxu1 %v393_v37  ;;  %v617_v37 = vld [vmem:[#allocation13 + $0xa0] sm:$0xff] }
  0x72   :  { %521 = vmatpush.msra.mxu0 %v325_v40  ;;  %v713_v40 = vld [vmem:[#allocation13 + $0x3a0] sm:$0xff] }
  0x73   :  { %541 = vmatpush.msra.mxu1 %v389_v41  ;;  %v615_v41 = vld [vmem:[#allocation13 + $0x90] sm:$0xff] }
  0x74   :  { %522 = vmatpush.msra.mxu0 %v321_v44  ;;  %v711_v44 = vld [vmem:[#allocation13 + $0x390] sm:$0xff] }
  0x75   :  { %542 = vmatpush.msra.mxu1 %v385_v45  ;;  %v613_v45 = vld [vmem:[#allocation13 + $0x80] sm:$0xff] }
  0x76   :  { %523 = vmatpush.msra.mxu0 %v317_v48  ;;  %v709_v48 = vld [vmem:[#allocation13 + $0x380] sm:$0xff] }
  0x77   :  { %543 = vmatpush.msra.mxu1 %v381_v49  ;;  %v611_v49 = vld [vmem:[#allocation13 + $0x70] sm:$0xff] }
  0x78   :  { %524 = vmatpush.msra.mxu0 %v313_v52  ;;  %v707_v52 = vld [vmem:[#allocation13 + $0x370] sm:$0xff] }
  0x79   :  { %544 = vmatpush.msra.mxu1 %v377_v53  ;;  %v609_v53 = vld [vmem:[#allocation13 + $0x60] sm:$0xff] }
  0x7a   :  { %525 = vmatpush.msra.mxu0 %v309_v56  ;;  %v705_v56 = vld [vmem:[#allocation13 + $0x360] sm:$0xff] }
  0x7c   :  { %526 = vmatpush.msra.mxu0 %v305_v60  ;;  %v703_v60 = vld [vmem:[#allocation13 + $0x350] sm:$0xff] }
  0x7e   :  { %527 = vmatpush.msra.mxu0 %v301_v0  ;;  %v701_v0 = vld [vmem:[#allocation13 + $0x340] sm:$0xff] }
  0x80   :  { %528 = vmatpush.msra.mxu0 %v297_v4  ;;  %v699_v4 = vld [vmem:[#allocation13 + $0x330] sm:$0xff] }
  0xbd   :  { %v191_v57 = vpop.f32.mrf.mxu0 }
  0xbe   :  { %v211_v58 = vpop.f32.mrf.mxu1  ;;  %v192_v61 = vadd.f32 %v927_v50, %v191_v57  ;;  %v318_v50 = vld [vmem:[#allocation11 + $0xb8] sm:$0xff]  ;;  %v373_v57 = vld [vmem:[#allocation11 + $0x270] sm:$0xff] }
  0xbf   :  { %545 = vmatpush.msra.mxu1 %v373_v57  ;;  %v607_v57 = vld [vmem:[#allocation13 + $0x50] sm:$0xff] }
  0xc0   :  { %v212_v2 = vadd.f32 %v211_v58, %v192_v61  ;;  %v310_v58 = vld [vmem:[#allocation11 + $0x78] sm:$0xff]  ;;  %v369_v61 = vld [vmem:[#allocation11 + $0x250] sm:$0xff] }
  0xc1   :  { %546 = vmatpush.msra.mxu1 %v369_v61  ;;  %v605_v61 = vld [vmem:[#allocation13 + $0x40] sm:$0xff] }
  0xc2   :  { %v214_v5 = vmax.f32 %v212_v2, 0.0  ;;  %v302_v2 = vld [vmem:[#allocation11 + $0x38] sm:$0xff] }
  0xc3   :  { %547 = vmatpush.msra.mxu1 %v365_v1  ;;  %v603_v1 = vld [vmem:[#allocation13 + $0x30] sm:$0xff] }
  0xc4   :  { %269 = vmatmul.f32.vlgmr.msra.gmra.mxu2 %v214_v5  ;;  %289 = vmatmul.f32.vlgmr.msra.gmra.mxu3 %v214_v5  ;;  %v361_v5 = vld [vmem:[#allocation11 + $0x210] sm:$0xff] }
  0xc5   :  { %553 = vmatpush.msra.mxu2 %v358_v10  ;;  %573 = vmatpush.msra.mxu3 %v422_v11  ;;  %v250_v10 = vperm.slane %v247_v8, 1  ;;  %v697_v8 = vld [vmem:[#allocation13 + $0x320] sm:$0xff] }
  0xc6   :  { %548 = vmatpush.msra.mxu1 %v361_v5  ;;  %v601_v5 = vld [vmem:[#allocation13 + $0x20] sm:$0xff] }
  0xc7   :  { %554 = vmatpush.msra.mxu2 %v354_v14  ;;  %574 = vmatpush.msra.mxu3 %v418_v15 }
  0xc9   :  { %555 = vmatpush.msra.mxu2 %v350_v18  ;;  %575 = vmatpush.msra.mxu3 %v414_v19  ;;  %v659_v18 = vld [vmem:[#allocation13 + $0x1f0] sm:$0xff] }
  0xca   :  { %v691_v19 = vld [vmem:[#allocation13 + $0x2f0] sm:$0xff] }
  0xcb   :  { %556 = vmatpush.msra.mxu2 %v346_v22  ;;  %576 = vmatpush.msra.mxu3 %v410_v23  ;;  %v657_v22 = vld [vmem:[#allocation13 + $0x1e0] sm:$0xff] }
  0xcc   :  { %v689_v23 = vld [vmem:[#allocation13 + $0x2e0] sm:$0xff] }
  0xcd   :  { %557 = vmatpush.msra.mxu2 %v342_v26  ;;  %577 = vmatpush.msra.mxu3 %v406_v27  ;;  %v655_v26 = vld [vmem:[#allocation13 + $0x1d0] sm:$0xff] }
  0xce   :  { %v687_v27 = vld [vmem:[#allocation13 + $0x2d0] sm:$0xff] }
  0xcf   :  { %558 = vmatpush.msra.mxu2 %v338_v30  ;;  %578 = vmatpush.msra.mxu3 %v402_v31  ;;  %v653_v30 = vld [vmem:[#allocation13 + $0x1c0] sm:$0xff] }
  0xd0   :  { %v685_v31 = vld [vmem:[#allocation13 + $0x2c0] sm:$0xff] }
  0xd1   :  { %559 = vmatpush.msra.mxu2 %v334_v34  ;;  %579 = vmatpush.msra.mxu3 %v398_v35  ;;  %v651_v34 = vld [vmem:[#allocation13 + $0x1b0] sm:$0xff] }
  0xd2   :  { %v683_v35 = vld [vmem:[#allocation13 + $0x2b0] sm:$0xff] }
  0xd3   :  { %560 = vmatpush.msra.mxu2 %v330_v38  ;;  %580 = vmatpush.msra.mxu3 %v394_v39  ;;  %v649_v38 = vld [vmem:[#allocation13 + $0x1a0] sm:$0xff] }
  0xd4   :  { %v681_v39 = vld [vmem:[#allocation13 + $0x2a0] sm:$0xff] }
  0xd5   :  { %561 = vmatpush.msra.mxu2 %v326_v42  ;;  %581 = vmatpush.msra.mxu3 %v390_v43  ;;  %v647_v42 = vld [vmem:[#allocation13 + $0x190] sm:$0xff] }
  0xd6   :  { %v679_v43 = vld [vmem:[#allocation13 + $0x290] sm:$0xff] }
  0xd7   :  { %562 = vmatpush.msra.mxu2 %v322_v46  ;;  %582 = vmatpush.msra.mxu3 %v386_v47  ;;  %v645_v46 = vld [vmem:[#allocation13 + $0x180] sm:$0xff] }
  0xd8   :  { %v677_v47 = vld [vmem:[#allocation13 + $0x280] sm:$0xff] }
  0xd9   :  { %563 = vmatpush.msra.mxu2 %v318_v50  ;;  %583 = vmatpush.msra.mxu3 %v382_v51  ;;  %v643_v50 = vld [vmem:[#allocation13 + $0x170] sm:$0xff] }
  0xda   :  { %v675_v51 = vld [vmem:[#allocation13 + $0x270] sm:$0xff] }
  0xdb   :  { %564 = vmatpush.msra.mxu2 %v314_v54  ;;  %584 = vmatpush.msra.mxu3 %v378_v55  ;;  %v641_v54 = vld [vmem:[#allocation13 + $0x160] sm:$0xff] }
  0xdc   :  { %v673_v55 = vld [vmem:[#allocation13 + $0x260] sm:$0xff] }
  0xdd   :  { %565 = vmatpush.msra.mxu2 %v310_v58  ;;  %585 = vmatpush.msra.mxu3 %v374_v59  ;;  %v639_v58 = vld [vmem:[#allocation13 + $0x150] sm:$0xff] }
  0xde   :  { %v671_v59 = vld [vmem:[#allocation13 + $0x250] sm:$0xff] }
  0xdf   :  { %566 = vmatpush.msra.mxu2 %v306_v62  ;;  %586 = vmatpush.msra.mxu3 %v370_v63  ;;  %v637_v62 = vld [vmem:[#allocation13 + $0x140] sm:$0xff] }
  0xe0   :  { %v669_v63 = vld [vmem:[#allocation13 + $0x240] sm:$0xff] }
  0xe1   :  { %567 = vmatpush.msra.mxu2 %v302_v2  ;;  %587 = vmatpush.msra.mxu3 %v366_v3  ;;  %v635_v2 = vld [vmem:[#allocation13 + $0x130] sm:$0xff] }
  0xe2   :  { %v667_v3 = vld [vmem:[#allocation13 + $0x230] sm:$0xff] }
  0xe3   :  { %568 = vmatpush.msra.mxu2 %v298_v6  ;;  %588 = vmatpush.msra.mxu3 %v362_v7  ;;  %v633_v6 = vld [vmem:[#allocation13 + $0x120] sm:$0xff] }
  0xe4   :  { %v665_v7 = vld [vmem:[#allocation13 + $0x220] sm:$0xff] }
 0x147   :  { %v270_v11 = vpop.f32.mrf.mxu2  ;;  %v290_v12 = vpop.f32.mrf.mxu3 }
 0x148   :  { %v271_v13 = vadd.f32 %v270_v11, %v249_v9  ;;  %v291_v14 = vadd.f32 %v290_v12, %v250_v10  ;;  %v599_v9 = vld [vmem:[#allocation13 + $0x10] sm:$0xff] }
 0x149   :  { %v631_v10 = vld [vmem:[#allocation13 + $0x110] sm:$0xff] }
 0x14a   :  { %v293_v15 = vmax.f32 %v271_v13, 0.0  ;;  %v294_v16 = vmax.f32 %v291_v14, 0.0  ;;  %v663_v11 = vld [vmem:[#allocation13 + $0x210] sm:$0xff]  ;;  %v597_v13 = vld [vmem:[#allocation13] sm:$0xff] }
 0x14b   :  { %v695_v12 = vld [vmem:[#allocation13 + $0x310] sm:$0xff]  ;;  %v629_v14 = vld [vmem:[#allocation13 + $0x100] sm:$0xff] }
 0x14c   :  { %449 = vmatmul.f32.vlgmr.msrb.gmra.mxu0 %v293_v15  ;;  %469 = vmatmul.f32.vlgmr.msrb.gmra.mxu1 %v294_v16 }
 0x14d   :  { %489 = vmatmul.f32.vlgmr.msrb.gmra.mxu2 %v293_v15  ;;  %509 = vmatmul.f32.vlgmr.msrb.gmra.mxu3 %v294_v16 }
 0x14e   :  { %731 = vmatpush.msrb.mxu0 %v627_v17  ;;  %751 = vmatpush.msrb.mxu1 %v659_v18  ;;  %v661_v17 = vld [vmem:[#allocation13 + $0x200] sm:$0xff] }
 0x14f   :  { %771 = vmatpush.msrb.mxu2 %v691_v19  ;;  %791 = vmatpush.msrb.mxu3 %v723_v20  ;;  %v693_v18 = vld [vmem:[#allocation13 + $0x300] sm:$0xff]  ;;  %v626_v19 = vld [vmem:[#allocation13 + $0xe8] sm:$0xff] }
 0x150   :  { %732 = vmatpush.msrb.mxu0 %v625_v21  ;;  %752 = vmatpush.msrb.mxu1 %v657_v22  ;;  %v658_v20 = vld [vmem:[#allocation13 + $0x1e8] sm:$0xff]  ;;  %v692_v21 = vld [vmem:[#allocation13 + $0x2f8] sm:$0xff] }
 0x151   :  { %772 = vmatpush.msrb.mxu2 %v689_v23  ;;  %792 = vmatpush.msrb.mxu3 %v721_v24  ;;  %v724_v22 = vld [vmem:[#allocation13 + $0x3f8] sm:$0xff] }
 0x152   :  { %733 = vmatpush.msrb.mxu0 %v623_v25  ;;  %753 = vmatpush.msrb.mxu1 %v655_v26  ;;  %v624_v23 = vld [vmem:[#allocation13 + $0xd8] sm:$0xff]  ;;  %v690_v25 = vld [vmem:[#allocation13 + $0x2e8] sm:$0xff] }
 0x153   :  { %773 = vmatpush.msrb.mxu2 %v687_v27  ;;  %793 = vmatpush.msrb.mxu3 %v719_v28  ;;  %v656_v24 = vld [vmem:[#allocation13 + $0x1d8] sm:$0xff]  ;;  %v622_v26 = vld [vmem:[#allocation13 + $0xc8] sm:$0xff] }
 0x154   :  { %529 = vmatmul.f32.vlgmr.msra.gmra.mxu0 %v293_v15  ;;  %549 = vmatmul.f32.vlgmr.msra.gmra.mxu1 %v294_v16  ;;  %v654_v27 = vld [vmem:[#allocation13 + $0x1c8] sm:$0xff]  ;;  %v688_v28 = vld [vmem:[#allocation13 + $0x2d8] sm:$0xff] }
 0x155   :  { %569 = vmatmul.f32.vlgmr.msra.gmra.mxu2 %v293_v15  ;;  %589 = vmatmul.f32.vlgmr.msra.gmra.mxu3 %v294_v16  ;;  %v628_v15 = vld [vmem:[#allocation13 + $0xf8] sm:$0xff] }
 0x156   :  { %734 = vmatpush.msrb.mxu0 %v621_v29  ;;  %754 = vmatpush.msrb.mxu1 %v653_v30  ;;  %v660_v16 = vld [vmem:[#allocation13 + $0x1f8] sm:$0xff] }
 0x157   :  { %774 = vmatpush.msrb.mxu2 %v685_v31  ;;  %794 = vmatpush.msrb.mxu3 %v717_v32  ;;  %v620_v29 = vld [vmem:[#allocation13 + $0xb8] sm:$0xff]  ;;  %v686_v31 = vld [vmem:[#allocation13 + $0x2c8] sm:$0xff] }
 0x158   :  { %735 = vmatpush.msrb.mxu0 %v619_v33  ;;  %755 = vmatpush.msrb.mxu1 %v651_v34  ;;  %v652_v30 = vld [vmem:[#allocation13 + $0x1b8] sm:$0xff]  ;;  %v618_v32 = vld [vmem:[#allocation13 + $0xa8] sm:$0xff] }
 0x159   :  { %775 = vmatpush.msrb.mxu2 %v683_v35  ;;  %795 = vmatpush.msrb.mxu3 %v715_v36  ;;  %v616_v33 = vld [vmem:[#allocation13 + $0x98] sm:$0xff]  ;;  %v614_v34 = vld [vmem:[#allocation13 + $0x88] sm:$0xff] }
 0x15a   :  { %736 = vmatpush.msrb.mxu0 %v617_v37  ;;  %756 = vmatpush.msrb.mxu1 %v649_v38  ;;  %v612_v35 = vld [vmem:[#allocation13 + $0x78] sm:$0xff]  ;;  %v650_v36 = vld [vmem:[#allocation13 + $0x1a8] sm:$0xff] }
 0x15b   :  { %776 = vmatpush.msrb.mxu2 %v681_v39  ;;  %796 = vmatpush.msrb.mxu3 %v713_v40  ;;  %v684_v37 = vld [vmem:[#allocation13 + $0x2b8] sm:$0xff]  ;;  %v722_v38 = vld [vmem:[#allocation13 + $0x3e8] sm:$0xff] }
 0x15c   :  { %737 = vmatpush.msrb.mxu0 %v615_v41  ;;  %757 = vmatpush.msrb.mxu1 %v647_v42  ;;  %v610_v39 = vld [vmem:[#allocation13 + $0x68] sm:$0xff]  ;;  %v648_v40 = vld [vmem:[#allocation13 + $0x198] sm:$0xff] }
 0x15d   :  { %777 = vmatpush.msrb.mxu2 %v679_v43  ;;  %797 = vmatpush.msrb.mxu3 %v711_v44  ;;  %v682_v41 = vld [vmem:[#allocation13 + $0x2a8] sm:$0xff]  ;;  %v720_v42 = vld [vmem:[#allocation13 + $0x3d8] sm:$0xff] }
 0x15e   :  { %738 = vmatpush.msrb.mxu0 %v613_v45  ;;  %758 = vmatpush.msrb.mxu1 %v645_v46  ;;  %v608_v43 = vld [vmem:[#allocation13 + $0x58] sm:$0xff]  ;;  %v646_v44 = vld [vmem:[#allocation13 + $0x188] sm:$0xff] }
 0x15f   :  { %778 = vmatpush.msrb.mxu2 %v677_v47  ;;  %798 = vmatpush.msrb.mxu3 %v709_v48  ;;  %v680_v45 = vld [vmem:[#allocation13 + $0x298] sm:$0xff]  ;;  %v718_v46 = vld [vmem:[#allocation13 + $0x3c8] sm:$0xff] }
 0x160   :  { %739 = vmatpush.msrb.mxu0 %v611_v49  ;;  %759 = vmatpush.msrb.mxu1 %v643_v50  ;;  %v606_v47 = vld [vmem:[#allocation13 + $0x48] sm:$0xff]  ;;  %v644_v48 = vld [vmem:[#allocation13 + $0x178] sm:$0xff] }
 0x161   :  { %779 = vmatpush.msrb.mxu2 %v675_v51  ;;  %799 = vmatpush.msrb.mxu3 %v707_v52  ;;  %v678_v49 = vld [vmem:[#allocation13 + $0x288] sm:$0xff]  ;;  %v716_v50 = vld [vmem:[#allocation13 + $0x3b8] sm:$0xff] }
 0x162   :  { %740 = vmatpush.msrb.mxu0 %v609_v53  ;;  %760 = vmatpush.msrb.mxu1 %v641_v54  ;;  %v604_v51 = vld [vmem:[#allocation13 + $0x38] sm:$0xff]  ;;  %v642_v52 = vld [vmem:[#allocation13 + $0x168] sm:$0xff] }
 0x163   :  { %780 = vmatpush.msrb.mxu2 %v673_v55  ;;  %800 = vmatpush.msrb.mxu3 %v705_v56  ;;  %v676_v53 = vld [vmem:[#allocation13 + $0x278] sm:$0xff]  ;;  %v714_v54 = vld [vmem:[#allocation13 + $0x3a8] sm:$0xff] }
 0x164   :  { %741 = vmatpush.msrb.mxu0 %v607_v57  ;;  %761 = vmatpush.msrb.mxu1 %v639_v58  ;;  %v602_v55 = vld [vmem:[#allocation13 + $0x28] sm:$0xff]  ;;  %v640_v56 = vld [vmem:[#allocation13 + $0x158] sm:$0xff] }
 0x165   :  { %781 = vmatpush.msrb.mxu2 %v671_v59  ;;  %801 = vmatpush.msrb.mxu3 %v703_v60  ;;  %v674_v57 = vld [vmem:[#allocation13 + $0x268] sm:$0xff]  ;;  %v712_v58 = vld [vmem:[#allocation13 + $0x398] sm:$0xff] }
 0x166   :  { %742 = vmatpush.msrb.mxu0 %v605_v61  ;;  %762 = vmatpush.msrb.mxu1 %v637_v62  ;;  %v600_v59 = vld [vmem:[#allocation13 + $0x18] sm:$0xff]  ;;  %v638_v60 = vld [vmem:[#allocation13 + $0x148] sm:$0xff] }
 0x167   :  { %782 = vmatpush.msrb.mxu2 %v669_v63  ;;  %802 = vmatpush.msrb.mxu3 %v701_v0  ;;  %v672_v61 = vld [vmem:[#allocation13 + $0x258] sm:$0xff]  ;;  %v710_v62 = vld [vmem:[#allocation13 + $0x388] sm:$0xff] }
 0x168   :  { %743 = vmatpush.msrb.mxu0 %v603_v1  ;;  %763 = vmatpush.msrb.mxu1 %v635_v2  ;;  %v598_v63 = vld [vmem:[#allocation13 + $0x8] sm:$0xff]  ;;  %v636_v0 = vld [vmem:[#allocation13 + $0x138] sm:$0xff] }
 0x169   :  { %783 = vmatpush.msrb.mxu2 %v667_v3  ;;  %803 = vmatpush.msrb.mxu3 %v699_v4  ;;  %v670_v1 = vld [vmem:[#allocation13 + $0x248] sm:$0xff]  ;;  %v708_v2 = vld [vmem:[#allocation13 + $0x378] sm:$0xff] }
 0x16a   :  { %744 = vmatpush.msrb.mxu0 %v601_v5  ;;  %764 = vmatpush.msrb.mxu1 %v633_v6  ;;  %v634_v3 = vld [vmem:[#allocation13 + $0x128] sm:$0xff]  ;;  %v668_v4 = vld [vmem:[#allocation13 + $0x238] sm:$0xff] }
 0x16b   :  { %784 = vmatpush.msrb.mxu2 %v665_v7  ;;  %804 = vmatpush.msrb.mxu3 %v697_v8  ;;  %v706_v5 = vld [vmem:[#allocation13 + $0x368] sm:$0xff]  ;;  %v632_v6 = vld [vmem:[#allocation13 + $0x118] sm:$0xff] }
 0x16c   :  { %745 = vmatpush.msrb.mxu0 %v599_v9  ;;  %765 = vmatpush.msrb.mxu1 %v631_v10  ;;  %v666_v7 = vld [vmem:[#allocation13 + $0x228] sm:$0xff]  ;;  %v704_v8 = vld [vmem:[#allocation13 + $0x358] sm:$0xff] }
 0x16d   :  { %785 = vmatpush.msrb.mxu2 %v663_v11  ;;  %805 = vmatpush.msrb.mxu3 %v695_v12  ;;  %v630_v9 = vld [vmem:[#allocation13 + $0x108] sm:$0xff]  ;;  %v664_v10 = vld [vmem:[#allocation13 + $0x218] sm:$0xff] }
 0x16e   :  { %746 = vmatpush.msrb.mxu0 %v597_v13  ;;  %766 = vmatpush.msrb.mxu1 %v629_v14  ;;  %v702_v11 = vld [vmem:[#allocation13 + $0x348] sm:$0xff]  ;;  %v700_v13 = vld [vmem:[#allocation13 + $0x338] sm:$0xff] }
 0x16f   :  { %786 = vmatpush.msrb.mxu2 %v661_v17  ;;  %806 = vmatpush.msrb.mxu3 %v693_v18  ;;  %v662_v12 = vld [vmem:[#allocation13 + $0x208] sm:$0xff] }
 0x170   :  { %811 = vmatpush.msra.mxu0 %v628_v15  ;;  %831 = vmatpush.msra.mxu1 %v660_v16  ;;  %v698_v14 = vld [vmem:[#allocation13 + $0x328] sm:$0xff]  ;;  %v696_v15 = vld [vmem:[#allocation13 + $0x318] sm:$0xff] }
 0x171   :  { %851 = vmatpush.msra.mxu2 %v692_v21  ;;  %871 = vmatpush.msra.mxu3 %v724_v22  ;;  %v423_v16 = vld [vmem:[%s1236_s6] sm:$0xf] }
 0x172   :  { %812 = vmatpush.msra.mxu0 %v626_v19  ;;  %832 = vmatpush.msra.mxu1 %v658_v20  ;;  %v694_v17 = vld [vmem:[#allocation13 + $0x308] sm:$0xff]  ;;  %v425_v18 = vperm.slane %v423_v16, 0 }
 0x173   :  { %852 = vmatpush.msra.mxu2 %v690_v25  ;;  %872 = vmatpush.msra.mxu3 %v722_v38  ;;  %v427_v25 = vperm.slane %v423_v16, 2 }
 0x174   :  { %813 = vmatpush.msra.mxu0 %v624_v23  ;;  %833 = vmatpush.msra.mxu1 %v656_v24  ;;  %v426_v23 = vperm.slane %v423_v16, 1 }
 0x175   :  { %853 = vmatpush.msra.mxu2 %v688_v28  ;;  %873 = vmatpush.msra.mxu3 %v720_v42  ;;  %v725_v42 = vld [vmem:[%s1238_s8] sm:$0x3] }
 0x176   :  { %814 = vmatpush.msra.mxu0 %v622_v26  ;;  %834 = vmatpush.msra.mxu1 %v654_v27 }
 0x177   :  { %854 = vmatpush.msra.mxu2 %v686_v31  ;;  %874 = vmatpush.msra.mxu3 %v718_v46 }
 0x178   :  { %815 = vmatpush.msra.mxu0 %v620_v29  ;;  %835 = vmatpush.msra.mxu1 %v652_v30 }
 0x179   :  { %855 = vmatpush.msra.mxu2 %v684_v37  ;;  %875 = vmatpush.msra.mxu3 %v716_v50 }
 0x17a   :  { %816 = vmatpush.msra.mxu0 %v618_v32  ;;  %836 = vmatpush.msra.mxu1 %v650_v36 }
 0x17b   :  { %856 = vmatpush.msra.mxu2 %v682_v41  ;;  %876 = vmatpush.msra.mxu3 %v714_v54 }
 0x17c   :  { %817 = vmatpush.msra.mxu0 %v616_v33  ;;  %837 = vmatpush.msra.mxu1 %v648_v40 }
 0x17d   :  { %857 = vmatpush.msra.mxu2 %v680_v45  ;;  %877 = vmatpush.msra.mxu3 %v712_v58 }
 0x17e   :  { %818 = vmatpush.msra.mxu0 %v614_v34  ;;  %838 = vmatpush.msra.mxu1 %v646_v44  ;;  %v727_v44 = vperm.slane %v725_v42, 0 }
 0x17f   :  { %858 = vmatpush.msra.mxu2 %v678_v49  ;;  %878 = vmatpush.msra.mxu3 %v710_v62  ;;  %v728_v49 = vperm.slane %v725_v42, 1 }
 0x180   :  { %819 = vmatpush.msra.mxu0 %v612_v35  ;;  %839 = vmatpush.msra.mxu1 %v644_v48  ;;  %v428_v35 = vperm.slane %v423_v16, 3 }
 0x181   :  { %859 = vmatpush.msra.mxu2 %v676_v53  ;;  %879 = vmatpush.msra.mxu3 %v708_v2 }
 0x182   :  { %820 = vmatpush.msra.mxu0 %v610_v39  ;;  %840 = vmatpush.msra.mxu1 %v642_v52 }
 0x183   :  { %860 = vmatpush.msra.mxu2 %v674_v57  ;;  %880 = vmatpush.msra.mxu3 %v706_v5 }
 0x184   :  { %821 = vmatpush.msra.mxu0 %v608_v43  ;;  %841 = vmatpush.msra.mxu1 %v640_v56 }
 0x185   :  { %861 = vmatpush.msra.mxu2 %v672_v61  ;;  %881 = vmatpush.msra.mxu3 %v704_v8 }
 0x186   :  { %822 = vmatpush.msra.mxu0 %v606_v47  ;;  %842 = vmatpush.msra.mxu1 %v638_v60 }
 0x187   :  { %862 = vmatpush.msra.mxu2 %v670_v1  ;;  %882 = vmatpush.msra.mxu3 %v702_v11 }
 0x188   :  { %823 = vmatpush.msra.mxu0 %v604_v51  ;;  %843 = vmatpush.msra.mxu1 %v636_v0 }
 0x189   :  { %863 = vmatpush.msra.mxu2 %v668_v4  ;;  %883 = vmatpush.msra.mxu3 %v700_v13 }
 0x18a   :  { %824 = vmatpush.msra.mxu0 %v602_v55  ;;  %844 = vmatpush.msra.mxu1 %v634_v3 }
 0x18b   :  { %864 = vmatpush.msra.mxu2 %v666_v7  ;;  %884 = vmatpush.msra.mxu3 %v698_v14 }
 0x18c   :  { %825 = vmatpush.msra.mxu0 %v600_v59  ;;  %845 = vmatpush.msra.mxu1 %v632_v6 }
 0x18d   :  { %865 = vmatpush.msra.mxu2 %v664_v10  ;;  %885 = vmatpush.msra.mxu3 %v696_v15 }
 0x18e   :  { %826 = vmatpush.msra.mxu0 %v598_v63  ;;  %846 = vmatpush.msra.mxu1 %v630_v9 }
 0x18f   :  { %866 = vmatpush.msra.mxu2 %v662_v12  ;;  %886 = vmatpush.msra.mxu3 %v694_v17 }
 0x1c9   :  { %v450_v19 = vpop.f32.mrf.mxu0  ;;  %v470_v20 = vpop.f32.mrf.mxu1 }
 0x1ca   :  { %v451_v21 = vadd.f32 %v450_v19, %v425_v18 }
 0x1cc   :  { %v471_v22 = vadd.f32 %v470_v20, %v451_v21 }
 0x1ce   :  { %v593_v24 = vmax.f32 %v471_v22, 0.0 }
 0x1d0   :  { %v490_v26 = vpop.f32.mrf.mxu2  ;;  %v510_v27 = vpop.f32.mrf.mxu3  ;;  %747 = vmatmul.f32.vlgmr.msrb.gmra.mxu0 %v593_v24 }
 0x1d1   :  { %v491_v28 = vadd.f32 %v490_v26, %v426_v23  ;;  %v530_v29 = vpop.f32.mrf.mxu0  ;;  %v550_v32 = vpop.f32.mrf.mxu1 }
 0x1d2   :  { %v531_v30 = vadd.f32 %v530_v29, %v427_v25 }
 0x1d3   :  { %v511_v31 = vadd.f32 %v510_v27, %v491_v28 }
 0x1d4   :  { %v551_v33 = vadd.f32 %v550_v32, %v531_v30 }
 0x1d5   :  { %v594_v34 = vmax.f32 %v511_v31, 0.0 }
 0x1d6   :  { %v595_v36 = vmax.f32 %v551_v33, 0.0 }
 0x1d7   :  { %767 = vmatmul.f32.vlgmr.msrb.gmra.mxu1 %v594_v34 }
 0x1d8   :  { %v570_v37 = vpop.f32.mrf.mxu2  ;;  %787 = vmatmul.f32.vlgmr.msrb.gmra.mxu2 %v595_v36  ;;  %827 = vmatmul.f32.vlgmr.msra.gmra.mxu0 %v593_v24  ;;  %v590_v39 = vpop.f32.mrf.mxu3 }
 0x1d9   :  { %v571_v38 = vadd.f32 %v570_v37, %v428_v35 }
 0x1db   :  { %v591_v40 = vadd.f32 %v590_v39, %v571_v38 }
 0x1dd   :  { %v596_v41 = vmax.f32 %v591_v40, 0.0 }
 0x1df   :  { %807 = vmatmul.f32.vlgmr.msrb.gmra.mxu3 %v596_v41  ;;  %847 = vmatmul.f32.vlgmr.msra.gmra.mxu1 %v594_v34 }
 0x1e0   :  { %867 = vmatmul.f32.vlgmr.msra.gmra.mxu2 %v595_v36 }
 0x1e7   :  { %887 = vmatmul.f32.vlgmr.msra.gmra.mxu3 %v596_v41 }
 0x24d   :  { %v748_v43 = vpop.f32.mrf.mxu0 }
 0x24e   :  { %v749_v47 = vadd.f32 %v748_v43, %v727_v44 }
 0x254   :  { %v768_v45 = vpop.f32.mrf.mxu1 }
 0x255   :  { %v769_v48 = vadd.f32 %v768_v45, %v749_v47  ;;  %v828_v51 = vpop.f32.mrf.mxu0 }
 0x256   :  { %v829_v55 = vadd.f32 %v828_v51, %v728_v49 }
 0x25b   :  { %v788_v46 = vpop.f32.mrf.mxu2 }
 0x25c   :  { %v789_v50 = vadd.f32 %v788_v46, %v769_v48  ;;  %v848_v54 = vpop.f32.mrf.mxu1 }
 0x25d   :  { %v849_v57 = vadd.f32 %v848_v54, %v829_v55 }
 0x262   :  { %v808_v52 = vpop.f32.mrf.mxu3 }
 0x263   :  { %v809_v53 = vadd.f32 %v808_v52, %v789_v50  ;;  %v868_v56 = vpop.f32.mrf.mxu2 }
 0x264   :  { %v869_v58 = vadd.f32 %v868_v56, %v849_v57 }
 0x265   :  { %891 = vst [vmem:[#allocation14] sm:$0xff] %v809_v53 }
 0x26a   :  { %v888_v59 = vpop.f32.mrf.mxu3 }
 0x26b   :  { %v889_v60 = vadd.f32 %v888_v59, %v869_v58 }
 0x26d   :  { %892 = vst [vmem:[#allocation14 + $0x8] sm:$0xff] %v889_v60 }
 0x26e   :  { %903 = dma.vmem_to_hbm [thread:$0]  %s899_s25, 256, %s901_s26, [#allocation4]  }
 0x26f   :  { %1128 = dma.done.wait [#allocation4], 256  }
 0x270   :  { %1129 = vsyncadd [#allocation4], 4294967040 }
 0x271   :  { %908 = vsyncpa [#allocation3], 1 }
 0x272   :  { %909 = vsyncpa [#allocation6], 1 }
 0x273   :  { %910 = vsyncpa [#allocation9], 1 }
 0x274   :  { %911 = vsyncpa [#allocation12], 1 }
 0x275   :  { %912 = vsyncpa [#allocation4], 1 }

</bundles_post_ra>
